<compile_context>
chip_gen: v7x
topology: tpu7x:2x2x1
jax: 0.10.0
libtpu: 0.0.40
codegen_flags: <defaults>
</compile_context>

<pallas_src>
import functools

import jax
import jax.numpy as jnp
from jax.experimental import pallas as pl
from jax.experimental.pallas import tpu as pltpu


def _cdiv(a, b):
    return (a + b - 1) // b


def _round_up(a, b):
    return _cdiv(a, b) * b


def _node_rnn2_kernel(
    x_ref, h_ref, row_ref, eg_ref,
    w_x3_ref, w_h3_ref, b_i3_ref, b_h3_ref,
    w1_ref, b1_ref, w2_ref, b2_ref,
    out_ref, hnew_ref,
    acc_ref,
):
    tile = x_ref.shape[0]
    echunk = row_ref.shape[1]
    rnn = hnew_ref.shape[1]
    c = pl.program_id(1)

    @pl.when(c == 0)
    def _():
        acc_ref[...] = jnp.zeros_like(acc_ref)

    # --- deterministic scatter_add of the precomputed per-edge gate contributions,
    #     expressed as a one-hot [tile, echunk] matmul on the MXU (60 output lanes).
    base = pl.program_id(0) * tile
    rows_rel = row_ref[...] - base                               # [1, echunk]
    onehot = (
        jax.lax.broadcasted_iota(jnp.int32, (tile, echunk), 0) == rows_rel
    ).astype(jnp.float32)                                        # [tile, echunk]
    acc_ref[...] += jnp.dot(onehot, eg_ref[...],
                            preferred_element_type=jnp.float32)  # [tile, 3*rnn]

    @pl.when(c == pl.num_programs(1) - 1)
    def _():
        x = x_ref[...]
        h = h_ref[...]

        # fused-gate GRU: gi/gh are [tile, 3*rnn] = [r | z | n]
        gi = (jnp.dot(x, w_x3_ref[...], preferred_element_type=jnp.float32)
              + acc_ref[...] + b_i3_ref[...])
        gh = (jnp.dot(h, w_h3_ref[...], preferred_element_type=jnp.float32)
              + b_h3_ref[...])

        # sigmoid(x) = 0.5 * (1 + tanh(0.5 * x))  -- exact, single EUP op, no divide
        rz = 0.5 * (1.0 + jnp.tanh(0.5 * (gi[:, : 2 * rnn] + gh[:, : 2 * rnn])))
        r = rz[:, :rnn]
        z = rz[:, rnn:]
        ngate = jnp.tanh(gi[:, 2 * rnn:] + r * gh[:, 2 * rnn:])
        h_new = (1.0 - z) * ngate + z * h

        # node_mlp: Linear(rnn -> hidden) -> LeakyReLU(0.01) -> Linear(hidden -> hidden)
        m = jnp.dot(h_new, w1_ref[...], preferred_element_type=jnp.float32) + b1_ref[...]
        m = jnp.where(m > 0, m, 0.01 * m)
        m = jnp.dot(m, w2_ref[...], preferred_element_type=jnp.float32) + b2_ref[...]

        out_ref[...] = m.astype(out_ref.dtype)
        hnew_ref[...] = h_new.astype(hnew_ref.dtype)


@functools.partial(jax.jit, static_argnames=("row_tile", "edge_chunk"))
def node_rnn_2_forward(x, edge_index, edge_attr, u, batch, hidden, params,
                       *, row_tile=512, edge_chunk=1024):
    """x: [N, node_f], edge_index: [2, E] int, edge_attr: [E, edge_f],
    hidden: [1, N, rnn].  u / batch are unused by the module's forward."""
    del u, batch  # unused by node_rnn_2.forward
    n, nf = x.shape
    e = edge_attr.shape[0]
    rnn = params["w_hr"].shape[0]
    hid = params["w1"].shape[1]

    # TODO(synk): only num_layers == 1 of the GRU stack is implemented (module default).
    h0 = hidden[0]

    # --- fuse the three GRU gates into single 3*rnn-lane operands.
    w_x3 = jnp.concatenate([params["w_xr"], params["w_xz"], params["w_xn"]], axis=1)
    w_h3 = jnp.concatenate([params["w_hr"], params["w_hz"], params["w_hn"]], axis=1)
    w_e3 = jnp.concatenate([params["w_er"], params["w_ez"], params["w_en"]], axis=1)
    b_i3 = jnp.concatenate([params["b_ir"], params["b_iz"], params["b_in"]], axis=1)
    b_h3 = jnp.concatenate([params["b_hr"], params["b_hz"], params["b_hn"]], axis=1)

    # --- precompute per-edge gate contributions: the in-kernel K=E contraction
    #     then produces 60 lanes instead of 3, and edge_agg never materializes.
    edge_gates = edge_attr @ w_e3                                 # [E, 3*rnn], f32

    # --- node-row tiling: bound padding to <8 rows per tile (ragged N).
    n_blocks = max(1, _cdiv(n, row_tile))
    tile = _round_up(_cdiv(n, n_blocks), 8)
    n_pad = _round_up(n, tile)
    if n_pad != n:
        x = jnp.pad(x, ((0, n_pad - n), (0, 0)))
        h0 = jnp.pad(h0, ((0, n_pad - n), (0, 0)))

    # --- edge-axis chunking: only one chunk of (row, edge_gates) is VMEM-resident.
    echunk = _round_up(min(edge_chunk, _round_up(e, 128)), 128)
    e_pad = _round_up(e, echunk)
    row = edge_index[0].astype(jnp.int32)
    if e_pad != e:
        row = jnp.pad(row, (0, e_pad - e), constant_values=-1)    # never matches a node
        edge_gates = jnp.pad(edge_gates, ((0, e_pad - e), (0, 0)))
    row = row.reshape(1, e_pad)

    grid = (n_pad // tile, e_pad // echunk)
    const2 = lambda i, c: (0, 0)

    out, h_new = pl.pallas_call(
        _node_rnn2_kernel,
        out_shape=(
            jax.ShapeDtypeStruct((n_pad, hid), x.dtype),
            jax.ShapeDtypeStruct((n_pad, rnn), x.dtype),
        ),
        grid_spec=pltpu.PrefetchScalarGridSpec(
            num_scalar_prefetch=0,
            grid=grid,
            in_specs=[
                pl.BlockSpec((tile, nf), lambda i, c: (i, 0)),
                pl.BlockSpec((tile, rnn), lambda i, c: (i, 0)),
                pl.BlockSpec((1, echunk), lambda i, c: (0, c)),
                pl.BlockSpec((echunk, 3 * rnn), lambda i, c: (c, 0)),
                pl.BlockSpec(w_x3.shape, const2),
                pl.BlockSpec(w_h3.shape, const2),
                pl.BlockSpec(b_i3.shape, const2),
                pl.BlockSpec(b_h3.shape, const2),
                pl.BlockSpec(params["w1"].shape, const2),
                pl.BlockSpec(params["b1"].shape, const2),
                pl.BlockSpec(params["w2"].shape, const2),
                pl.BlockSpec(params["b2"].shape, const2),
            ],
            out_specs=[
                pl.BlockSpec((tile, hid), lambda i, c: (i, 0)),
                pl.BlockSpec((tile, rnn), lambda i, c: (i, 0)),
            ],
            scratch_shapes=[pltpu.VMEM((tile, 3 * rnn), jnp.float32)],
        ),
        compiler_params=pltpu.CompilerParams(
            dimension_semantics=("parallel", "arbitrary"),
        ),
    )(x, h0, row, edge_gates,
      w_x3, w_h3, b_i3, b_h3,
      params["w1"], params["b1"], params["w2"], params["b2"])

    return out[:n], h_new[:n][None]


def init_params(key, node_features=5, edge_features=3, rnn_size=20, hidden_size=64):
    """Deterministic synthetic parameters.  All weights stored [in, out];
    GRU input weights split per gate (r, z, n) and per input part (x / edge_agg)."""
    ks = jax.random.split(key, 19)

    def unif(k, shape, fan):
        s = 1.0 / jnp.sqrt(fan)
        return jax.random.uniform(k, shape, jnp.float32, -s, s)

    p = {
        "w_xr": unif(ks[0], (node_features, rnn_size), rnn_size),
        "w_xz": unif(ks[1], (node_features, rnn_size), rnn_size),
        "w_xn": unif(ks[2], (node_features, rnn_size), rnn_size),
        "w_er": unif(ks[3], (edge_features, rnn_size), rnn_size),
        "w_ez": unif(ks[4], (edge_features, rnn_size), rnn_size),
        "w_en": unif(ks[5], (edge_features, rnn_size), rnn_size),
        "w_hr": unif(ks[6], (rnn_size, rnn_size), rnn_size),
        "w_hz": unif(ks[7], (rnn_size, rnn_size), rnn_size),
        "w_hn": unif(ks[8], (rnn_size, rnn_size), rnn_size),
        "b_ir": unif(ks[9], (1, rnn_size), rnn_size),
        "b_iz": unif(ks[10], (1, rnn_size), rnn_size),
        "b_in": unif(ks[11], (1, rnn_size), rnn_size),
        "b_hr": unif(ks[12], (1, rnn_size), rnn_size),
        "b_hz": unif(ks[13], (1, rnn_size), rnn_size),
        "b_hn": unif(ks[14], (1, rnn_size), rnn_size),
        "w1": unif(ks[15], (rnn_size, hidden_size), rnn_size),
        "b1": unif(ks[16], (1, hidden_size), rnn_size),
        "w2": unif(ks[17], (hidden_size, hidden_size), hidden_size),
        "b2": unif(ks[18], (1, hidden_size), hidden_size),
    }
    return p


def reference_forward(x, edge_index, edge_attr, u, batch, hidden, params):
    """Pure-JAX reference implementing the PyTorch module's forward."""
    del u, batch
    n = x.shape[0]
    row = edge_index[0]
    eagg = jnp.zeros((n, edge_attr.shape[1]), x.dtype).at[row].add(edge_attr)
    xin = jnp.concatenate([x, eagg], axis=1)
    h = hidden[0]

    w_ir = jnp.concatenate([params["w_xr"], params["w_er"]], axis=0)
    w_iz = jnp.concatenate([params["w_xz"], params["w_ez"]], axis=0)
    w_in = jnp.concatenate([params["w_xn"], params["w_en"]], axis=0)

    gi_r = xin @ w_ir + params["b_ir"]
    gi_z = xin @ w_iz + params["b_iz"]
    gi_n = xin @ w_in + params["b_in"]
    gh_r = h @ params["w_hr"] + params["b_hr"]
    gh_z = h @ params["w_hz"] + params["b_hz"]
    gh_n = h @ params["w_hn"] + params["b_hn"]

    r = 1.0 / (1.0 + jnp.exp(-(gi_r + gh_r)))
    z = 1.0 / (1.0 + jnp.exp(-(gi_z + gh_z)))
    ngate = jnp.tanh(gi_n + r * gh_n)
    h_new = (1.0 - z) * ngate + z * h

    m = h_new @ params["w1"] + params["b1"]
    m = jnp.where(m > 0, m, 0.01 * m)
    out = m @ params["w2"] + params["b2"]
    return out, h_new[None]


if __name__ == "__main__":
    key = jax.random.PRNGKey(0)
    kx, ke, ka, kh, kp = jax.random.split(key, 5)

    N, E = 64, 128
    NODE_F, EDGE_F, RNN, HIDDEN = 5, 3, 20, 64

    x = jax.random.normal(kx, (N, NODE_F), jnp.float32)
    edge_index = jax.random.randint(ke, (2, E), 0, N, jnp.int32)
    edge_attr = jax.random.normal(ka, (E, EDGE_F), jnp.float32)
    hidden = jax.random.normal(kh, (1, N, RNN), jnp.float32)
    u = jnp.zeros((1, 4), jnp.float32)      # unused by forward
    batch = jnp.zeros((N,), jnp.int32)      # unused by forward
    params = init_params(kp, NODE_F, EDGE_F, RNN, HIDDEN)

    out, h_new = node_rnn_2_forward(x, edge_index, edge_attr, u, batch, hidden, params)
    out = jax.block_until_ready(out)
    h_new = jax.block_until_ready(h_new)

    ref_out, ref_h = reference_forward(x, edge_index, edge_attr, u, batch, hidden, params)

    assert out.shape == (N, HIDDEN)
    assert h_new.shape == (1, N, RNN)
    assert jnp.allclose(out, ref_out, atol=1e-4, rtol=1e-4)
    assert jnp.allclose(h_new, ref_h, atol=1e-4, rtol=1e-4)

    print("KERNEL_OK")
</pallas_src>

<mosaic_0001>
module attributes {stable_mosaic.version = 11 : i64} {
  func.func @_node_rnn2_kernel(%arg0: i32, %arg1: i32, %arg2: memref<64x5xf32, #tpu.memory_space<vmem>>, %arg3: memref<64x20xf32, #tpu.memory_space<vmem>>, %arg4: memref<1x128xi32, #tpu.memory_space<vmem>>, %arg5: memref<128x60xf32, #tpu.memory_space<vmem>>, %arg6: memref<5x60xf32, #tpu.memory_space<vmem>>, %arg7: memref<20x60xf32, #tpu.memory_space<vmem>>, %arg8: memref<1x60xf32, #tpu.memory_space<vmem>>, %arg9: memref<1x60xf32, #tpu.memory_space<vmem>>, %arg10: memref<20x64xf32, #tpu.memory_space<vmem>>, %arg11: memref<1x64xf32, #tpu.memory_space<vmem>>, %arg12: memref<64x64xf32, #tpu.memory_space<vmem>>, %arg13: memref<1x64xf32, #tpu.memory_space<vmem>>, %arg14: memref<64x64xf32, #tpu.memory_space<vmem>>, %arg15: memref<64x20xf32, #tpu.memory_space<vmem>>, %arg16: memref<64x60xf32, #tpu.memory_space<vmem>>) attributes {dimension_semantics = [#tpu.dimension_semantics<parallel>, #tpu.dimension_semantics<arbitrary>], iteration_bounds = array<i64: 1, 1>, scalar_prefetch = 0 : i64, scratch_operands = 1 : i64, tpu.core_type = #tpu.core_type<tc>, window_params = [{transform_indices = @transform_0, window_bounds = array<i64: 64, 5>}, {transform_indices = @transform_1, window_bounds = array<i64: 64, 20>}, {transform_indices = @transform_2, window_bounds = array<i64: 1, 128>}, {transform_indices = @transform_3, window_bounds = array<i64: 128, 60>}, {pipeline_mode = #tpu.pipeline_mode<synchronous>, transform_indices = @transform_4, window_bounds = array<i64: 5, 60>}, {pipeline_mode = #tpu.pipeline_mode<synchronous>, transform_indices = @transform_5, window_bounds = array<i64: 20, 60>}, {pipeline_mode = #tpu.pipeline_mode<synchronous>, transform_indices = @transform_6, window_bounds = array<i64: 1, 60>}, {pipeline_mode = #tpu.pipeline_mode<synchronous>, transform_indices = @transform_7, window_bounds = array<i64: 1, 60>}, {pipeline_mode = #tpu.pipeline_mode<synchronous>, transform_indices = @transform_8, window_bounds = array<i64: 20, 64>}, {pipeline_mode = #tpu.pipeline_mode<synchronous>, transform_indices = @transform_9, window_bounds = array<i64: 1, 64>}, {pipeline_mode = #tpu.pipeline_mode<synchronous>, transform_indices = @transform_10, window_bounds = array<i64: 64, 64>}, {pipeline_mode = #tpu.pipeline_mode<synchronous>, transform_indices = @transform_11, window_bounds = array<i64: 1, 64>}, {transform_indices = @transform_12, window_bounds = array<i64: 64, 64>}, {transform_indices = @transform_13, window_bounds = array<i64: 64, 20>}]} {
    %c0_i32 = arith.constant 0 : i32
    %0 = arith.cmpi eq, %arg1, %c0_i32 : i32
    %1 = arith.extui %0 : i1 to i32
    %c0_i32_0 = arith.constant 0 : i32
    %2 = arith.cmpi ne, %1, %c0_i32_0 : i32
    scf.if %2 {
      %cst_10 = arith.constant 0.000000e+00 : f32
      %20 = vector.broadcast %cst_10 : f32 to vector<64x60xf32>
      %c0_11 = arith.constant 0 : index
      %c0_12 = arith.constant 0 : index
      %21 = vector.load %arg16[%c0_11, %c0_12] : memref<64x60xf32, #tpu.memory_space<vmem>>, vector<64x60xf32>
      tpu.vector_store %arg16[%c0_11, %c0_12], %20 {strides = array<i32>} : memref<64x60xf32, #tpu.memory_space<vmem>>, vector<64x60xf32>,
    } else {
    }
    %c64_i32 = arith.constant 64 : i32
    %3 = arith.muli %arg0, %c64_i32 : i32
    %c0 = arith.constant 0 : index
    %c0_1 = arith.constant 0 : index
    %4 = vector.load %arg4[%c0, %c0_1] : memref<1x128xi32, #tpu.memory_space<vmem>>, vector<1x128xi32>
    %5 = vector.broadcast %3 : i32 to vector<1x128xi32>
    %6 = arith.subi %4, %5 : vector<1x128xi32>
    %7 = tpu.iota {dimensions = array<i32: 0>} : vector<64x128xi32>
    %8 = vector.broadcast %6 : vector<1x128xi32> to vector<64x128xi32>
    %9 = arith.cmpi eq, %7, %8 : vector<64x128xi32>
    %10 = arith.extui %9 : vector<64x128xi1> to vector<64x128xi32>
    %11 = arith.sitofp %10 : vector<64x128xi32> to vector<64x128xf32>
    %c0_2 = arith.constant 0 : index
    %c0_3 = arith.constant 0 : index
    %12 = vector.load %arg16[%c0_2, %c0_3] : memref<64x60xf32, #tpu.memory_space<vmem>>, vector<64x60xf32>
    %c0_4 = arith.constant 0 : index
    %c0_5 = arith.constant 0 : index
    %13 = vector.load %arg5[%c0_4, %c0_5] : memref<128x60xf32, #tpu.memory_space<vmem>>, vector<128x60xf32>
    %cst = arith.constant dense<0.000000e+00> : vector<64x60xf32>
    %14 = tpu.matmul %11, %13, %cst {dimension_numbers = #tpu.dot_dimension_numbers<[1], [0], [0], [1], [0, 0, 1, 1], [], []>} : vector<64x128xf32>, vector<128x60xf32>, vector<64x60xf32> -> vector<64x60xf32>
    %15 = arith.addf %12, %14 : vector<64x60xf32>
    %c0_6 = arith.constant 0 : index
    %c0_7 = arith.constant 0 : index
    %16 = vector.load %arg16[%c0_6, %c0_7] : memref<64x60xf32, #tpu.memory_space<vmem>>, vector<64x60xf32>
    tpu.vector_store %arg16[%c0_6, %c0_7], %15 {strides = array<i32>} : memref<64x60xf32, #tpu.memory_space<vmem>>, vector<64x60xf32>,
    %c0_i32_8 = arith.constant 0 : i32
    %17 = arith.cmpi eq, %arg1, %c0_i32_8 : i32
    %18 = arith.extui %17 : i1 to i32
    %c0_i32_9 = arith.constant 0 : i32
    %19 = arith.cmpi ne, %18, %c0_i32_9 : i32
    scf.if %19 {
      %c0_10 = arith.constant 0 : index
      %c0_11 = arith.constant 0 : index
      %20 = vector.load %arg2[%c0_10, %c0_11] : memref<64x5xf32, #tpu.memory_space<vmem>>, vector<64x5xf32>
      %c0_12 = arith.constant 0 : index
      %c0_13 = arith.constant 0 : index
      %21 = vector.load %arg3[%c0_12, %c0_13] : memref<64x20xf32, #tpu.memory_space<vmem>>, vector<64x20xf32>
      %c0_14 = arith.constant 0 : index
      %c0_15 = arith.constant 0 : index
      %22 = vector.load %arg6[%c0_14, %c0_15] : memref<5x60xf32, #tpu.memory_space<vmem>>, vector<5x60xf32>
      %cst_16 = arith.constant dense<0.000000e+00> : vector<64x60xf32>
      %23 = tpu.matmul %20, %22, %cst_16 {dimension_numbers = #tpu.dot_dimension_numbers<[1], [0], [0], [1], [0, 0, 1, 1], [], []>} : vector<64x5xf32>, vector<5x60xf32>, vector<64x60xf32> -> vector<64x60xf32>
      %c0_17 = arith.constant 0 : index
      %c0_18 = arith.constant 0 : index
      %24 = vector.load %arg16[%c0_17, %c0_18] : memref<64x60xf32, #tpu.memory_space<vmem>>, vector<64x60xf32>
      %25 = arith.addf %23, %24 : vector<64x60xf32>
      %c0_19 = arith.constant 0 : index
      %c0_20 = arith.constant 0 : index
      %26 = vector.load %arg8[%c0_19, %c0_20] : memref<1x60xf32, #tpu.memory_space<vmem>>, vector<1x60xf32>
      %27 = vector.broadcast %26 : vector<1x60xf32> to vector<64x60xf32>
      %28 = arith.addf %25, %27 : vector<64x60xf32>
      %c0_21 = arith.constant 0 : index
      %c0_22 = arith.constant 0 : index
      %29 = vector.load %arg7[%c0_21, %c0_22] : memref<20x60xf32, #tpu.memory_space<vmem>>, vector<20x60xf32>
      %cst_23 = arith.constant dense<0.000000e+00> : vector<64x60xf32>
      %30 = tpu.matmul %21, %29, %cst_23 {dimension_numbers = #tpu.dot_dimension_numbers<[1], [0], [0], [1], [0, 0, 1, 1], [], []>} : vector<64x20xf32>, vector<20x60xf32>, vector<64x60xf32> -> vector<64x60xf32>
      %c0_24 = arith.constant 0 : index
      %c0_25 = arith.constant 0 : index
      %31 = vector.load %arg9[%c0_24, %c0_25] : memref<1x60xf32, #tpu.memory_space<vmem>>, vector<1x60xf32>
      %32 = vector.broadcast %31 : vector<1x60xf32> to vector<64x60xf32>
      %33 = arith.addf %30, %32 : vector<64x60xf32>
      %34 = vector.extract_strided_slice %28 {offsets = [0, 0], sizes = [64, 40], strides = [1, 1]} : vector<64x60xf32> to vector<64x40xf32>
      %35 = vector.extract_strided_slice %33 {offsets = [0, 0], sizes = [64, 40], strides = [1, 1]} : vector<64x60xf32> to vector<64x40xf32>
      %36 = arith.addf %34, %35 : vector<64x40xf32>
      %cst_26 = arith.constant 5.000000e-01 : f32
      %37 = vector.broadcast %cst_26 : f32 to vector<64x40xf32>
      %38 = arith.mulf %37, %36 : vector<64x40xf32>
      %39 = math.tanh %38 : vector<64x40xf32>
      %cst_27 = arith.constant 1.000000e+00 : f32
      %40 = vector.broadcast %cst_27 : f32 to vector<64x40xf32>
      %41 = arith.addf %40, %39 : vector<64x40xf32>
      %cst_28 = arith.constant 5.000000e-01 : f32
      %42 = vector.broadcast %cst_28 : f32 to vector<64x40xf32>
      %43 = arith.mulf %42, %41 : vector<64x40xf32>
      %44 = vector.extract_strided_slice %43 {offsets = [0, 0], sizes = [64, 20], strides = [1, 1]} : vector<64x40xf32> to vector<64x20xf32>
      %45 = vector.extract_strided_slice %43 {offsets = [0, 20], sizes = [64, 20], strides = [1, 1]} : vector<64x40xf32> to vector<64x20xf32>
      %46 = vector.extract_strided_slice %28 {offsets = [0, 40], sizes = [64, 20], strides = [1, 1]} : vector<64x60xf32> to vector<64x20xf32>
      %47 = vector.extract_strided_slice %33 {offsets = [0, 40], sizes = [64, 20], strides = [1, 1]} : vector<64x60xf32> to vector<64x20xf32>
      %48 = arith.mulf %44, %47 : vector<64x20xf32>
      %49 = arith.addf %46, %48 : vector<64x20xf32>
      %50 = math.tanh %49 : vector<64x20xf32>
      %cst_29 = arith.constant 1.000000e+00 : f32
      %51 = vector.broadcast %cst_29 : f32 to vector<64x20xf32>
      %52 = arith.subf %51, %45 : vector<64x20xf32>
      %53 = arith.mulf %52, %50 : vector<64x20xf32>
      %54 = arith.mulf %45, %21 : vector<64x20xf32>
      %55 = arith.addf %53, %54 : vector<64x20xf32>
      %c0_30 = arith.constant 0 : index
      %c0_31 = arith.constant 0 : index
      %56 = vector.load %arg10[%c0_30, %c0_31] : memref<20x64xf32, #tpu.memory_space<vmem>>, vector<20x64xf32>
      %cst_32 = arith.constant dense<0.000000e+00> : vector<64x64xf32>
      %57 = tpu.matmul %55, %56, %cst_32 {dimension_numbers = #tpu.dot_dimension_numbers<[1], [0], [0], [1], [0, 0, 1, 1], [], []>} : vector<64x20xf32>, vector<20x64xf32>, vector<64x64xf32> -> vector<64x64xf32>
      %c0_33 = arith.constant 0 : index
      %c0_34 = arith.constant 0 : index
      %58 = vector.load %arg11[%c0_33, %c0_34] : memref<1x64xf32, #tpu.memory_space<vmem>>, vector<1x64xf32>
      %59 = vector.broadcast %58 : vector<1x64xf32> to vector<64x64xf32>
      %60 = arith.addf %57, %59 : vector<64x64xf32>
      %cst_35 = arith.constant 0.000000e+00 : f32
      %61 = vector.broadcast %cst_35 : f32 to vector<64x64xf32>
      %62 = arith.cmpf ogt, %60, %61 : vector<64x64xf32>
      %cst_36 = arith.constant 0.00999999977 : f32
      %63 = vector.broadcast %cst_36 : f32 to vector<64x64xf32>
      %64 = arith.mulf %63, %60 : vector<64x64xf32>
      %65 = arith.select %62, %60, %64 : vector<64x64xi1>, vector<64x64xf32>
      %c0_37 = arith.constant 0 : index
      %c0_38 = arith.constant 0 : index
      %66 = vector.load %arg12[%c0_37, %c0_38] : memref<64x64xf32, #tpu.memory_space<vmem>>, vector<64x64xf32>
      %cst_39 = arith.constant dense<0.000000e+00> : vector<64x64xf32>
      %67 = tpu.matmul %65, %66, %cst_39 {dimension_numbers = #tpu.dot_dimension_numbers<[1], [0], [0], [1], [0, 0, 1, 1], [], []>} : vector<64x64xf32>, vector<64x64xf32>, vector<64x64xf32> -> vector<64x64xf32>
      %c0_40 = arith.constant 0 : index
      %c0_41 = arith.constant 0 : index
      %68 = vector.load %arg13[%c0_40, %c0_41] : memref<1x64xf32, #tpu.memory_space<vmem>>, vector<1x64xf32>
      %69 = vector.broadcast %68 : vector<1x64xf32> to vector<64x64xf32>
      %70 = arith.addf %67, %69 : vector<64x64xf32>
      %c0_42 = arith.constant 0 : index
      %c0_43 = arith.constant 0 : index
      %71 = vector.load %arg14[%c0_42, %c0_43] : memref<64x64xf32, #tpu.memory_space<vmem>>, vector<64x64xf32>
      tpu.vector_store %arg14[%c0_42, %c0_43], %70 {strides = array<i32>} : memref<64x64xf32, #tpu.memory_space<vmem>>, vector<64x64xf32>,
      %c0_44 = arith.constant 0 : index
      %c0_45 = arith.constant 0 : index
      %72 = vector.load %arg15[%c0_44, %c0_45] : memref<64x20xf32, #tpu.memory_space<vmem>>, vector<64x20xf32>
      tpu.vector_store %arg15[%c0_44, %c0_45], %55 {strides = array<i32>} : memref<64x20xf32, #tpu.memory_space<vmem>>, vector<64x20xf32>,
    } else {
    }
    return
  }
  func.func @transform_0(%arg0: i32, %arg1: i32) -> (i32, i32) {
    %c0_i32 = arith.constant 0 : i32
    %c0_i32_0 = arith.constant 0 : i32
    return %arg0, %c0_i32 : i32, i32
  }
  func.func @transform_1(%arg0: i32, %arg1: i32) -> (i32, i32) {
    %c0_i32 = arith.constant 0 : i32
    %c0_i32_0 = arith.constant 0 : i32
    return %arg0, %c0_i32 : i32, i32
  }
  func.func @transform_2(%arg0: i32, %arg1: i32) -> (i32, i32) {
    %c0_i32 = arith.constant 0 : i32
    %c0_i32_0 = arith.constant 0 : i32
    return %c0_i32, %arg1 : i32, i32
  }
  func.func @transform_3(%arg0: i32, %arg1: i32) -> (i32, i32) {
    %c0_i32 = arith.constant 0 : i32
    %c0_i32_0 = arith.constant 0 : i32
    return %arg1, %c0_i32 : i32, i32
  }
  func.func @transform_4(%arg0: i32, %arg1: i32) -> (i32, i32) {
    %c0_i32 = arith.constant 0 : i32
    %c0_i32_0 = arith.constant 0 : i32
    %c0_i32_1 = arith.constant 0 : i32
    return %c0_i32, %c0_i32_0 : i32, i32
  }
  func.func @transform_5(%arg0: i32, %arg1: i32) -> (i32, i32) {
    %c0_i32 = arith.constant 0 : i32
    %c0_i32_0 = arith.constant 0 : i32
    %c0_i32_1 = arith.constant 0 : i32
    return %c0_i32, %c0_i32_0 : i32, i32
  }
  func.func @transform_6(%arg0: i32, %arg1: i32) -> (i32, i32) {
    %c0_i32 = arith.constant 0 : i32
    %c0_i32_0 = arith.constant 0 : i32
    %c0_i32_1 = arith.constant 0 : i32
    return %c0_i32, %c0_i32_0 : i32, i32
  }
  func.func @transform_7(%arg0: i32, %arg1: i32) -> (i32, i32) {
    %c0_i32 = arith.constant 0 : i32
    %c0_i32_0 = arith.constant 0 : i32
    %c0_i32_1 = arith.constant 0 : i32
    return %c0_i32, %c0_i32_0 : i32, i32
  }
  func.func @transform_8(%arg0: i32, %arg1: i32) -> (i32, i32) {
    %c0_i32 = arith.constant 0 : i32
    %c0_i32_0 = arith.constant 0 : i32
    %c0_i32_1 = arith.constant 0 : i32
    return %c0_i32, %c0_i32_0 : i32, i32
  }
  func.func @transform_9(%arg0: i32, %arg1: i32) -> (i32, i32) {
    %c0_i32 = arith.constant 0 : i32
    %c0_i32_0 = arith.constant 0 : i32
    %c0_i32_1 = arith.constant 0 : i32
    return %c0_i32, %c0_i32_0 : i32, i32
  }
  func.func @transform_10(%arg0: i32, %arg1: i32) -> (i32, i32) {
    %c0_i32 = arith.constant 0 : i32
    %c0_i32_0 = arith.constant 0 : i32
    %c0_i32_1 = arith.constant 0 : i32
    return %c0_i32, %c0_i32_0 : i32, i32
  }
  func.func @transform_11(%arg0: i32, %arg1: i32) -> (i32, i32) {
    %c0_i32 = arith.constant 0 : i32
    %c0_i32_0 = arith.constant 0 : i32
    %c0_i32_1 = arith.constant 0 : i32
    return %c0_i32, %c0_i32_0 : i32, i32
  }
  func.func @transform_12(%arg0: i32, %arg1: i32) -> (i32, i32) {
    %c0_i32 = arith.constant 0 : i32
    %c0_i32_0 = arith.constant 0 : i32
    return %arg0, %c0_i32 : i32, i32
  }
  func.func @transform_13(%arg0: i32, %arg1: i32) -> (i32, i32) {
    %c0_i32 = arith.constant 0 : i32
    %c0_i32_0 = arith.constant 0 : i32
    return %arg0, %c0_i32 : i32, i32
  }
}

</mosaic_0001>

<bundles_post_ra>
// kernel: node_rnn_2_forward.1
= control target key start
LH: loop header
LB: loop body
LE: loop exit
PB: predicated region body
PF: predicated region fallthrough
CT: control target
= control target key end

     0   :  { %vm297_vm0 = vcmask 1044480   ;;  %vm272_vm1 = vcmask 39936   ;;  %vm456_vm2 = vcmask 1043456   ;;  %v61_v18 = vlaneseq  ;;  %s2073_s0 = inlined_call_operand.vmem [shape: f32[64,5], index: 0, kind: input, shape index: {}]   ;;  %s2074_s1 = inlined_call_operand.vmem [shape: f32[64,20], index: 1, kind: input, shape index: {}]   ;;  %s2075_s2 = inlined_call_operand.vmem [shape: s32[1,128], index: 2, kind: input, shape index: {}]   ;;  %s2076_s3 = inlined_call_operand.vmem [shape: f32[128,60], index: 3, kind: input, shape index: {}]   ;;  %s2077_s4 = inlined_call_operand.vmem [shape: f32[5,60], index: 4, kind: input, shape index: {}]   ;;  %s2078_s5 = inlined_call_operand.vmem [shape: f32[20,60], index: 5, kind: input, shape index: {}]   ;;  %s2079_s6 = inlined_call_operand.vmem [shape: f32[1,60], index: 6, kind: input, shape index: {}]   ;;  %s2080_s7 = inlined_call_operand.vmem [shape: f32[1,60], index: 7, kind: input, shape index: {}]   ;;  %s2081_s8 = inlined_call_operand.vmem [shape: f32[20,64], index: 8, kind: input, shape index: {}]   ;;  %s2082_s9 = inlined_call_operand.vmem [shape: f32[1,64], index: 9, kind: input, shape index: {}]   ;;  %s2083_s10 = inlined_call_operand.vmem [shape: f32[64,64], index: 10, kind: input, shape index: {}]   ;;  %s2084_s11 = inlined_call_operand.vmem [shape: f32[1,64], index: 11, kind: input, shape index: {}]   ;;  %s2085_s12 = inlined_call_operand.hbm [shape: f32[64,64], index: 12, kind: output, shape index: {0}]   ;;  %s2086_s13 = inlined_call_operand.vmem [shape: f32[64,20], index: 13, kind: output, shape index: {1}]  }
   0x1   :  { %v263_v0 = vld [vmem:[%s2077_s4] sm:$0x1f]  ;;  %v107_v3 = vld [vmem:[%s2076_s3 + $0x8] sm:$0xff]  ;;  %v249_v8 = vld [vmem:[%s2073_s0 + $0x10] sm:$0xff] }
   0x2   :  { %v247_v1 = vld [vmem:[%s2073_s0] sm:$0xff]  ;;  %1323 = vmatprep.subr.msk.mxu1 %vm297_vm0, %v263_v0  ;;  %v248_v4 = vld [vmem:[%s2073_s0 + $0x8] sm:$0xff]  ;;  %v108_v9 = vld [vmem:[%s2076_s3 + $0x10] sm:$0xff]  ;;  %v1672_v24 = vshrl.u32 %v61_v18, 7 }
   0x3   :  { %v106_v2 = vld [vmem:[%s2076_s3] sm:$0xff]  ;;  %1325 = vmatprep.mubr.msk.f32.mxu1 %vm272_vm1, %v247_v1  ;;  %1324 = vmatpush3.msk.msra.mxu1 %vm297_vm0, %v263_v0  ;;  %v422_v7 = vld [vmem:[%s2078_s5 + $0x8] sm:$0xff]  ;;  %v109_v11 = vld [vmem:[%s2076_s3 + $0x18] sm:$0xff] }
   0x4   :  { %v421_v5 = vld [vmem:[%s2078_s5] sm:$0xff]  ;;  %v1401_v6 = vpack.c.bf16 %v107_v3, %v106_v2  ;;  %1326 = vmatmul.mubr.msk.f32.vlgmr.msra.gmra.mrb[0].mxu1 %vm272_vm1, %v248_v4  ;;  %v1405_v12 = vpack.c.bf16 %v109_v11, %v108_v9  ;;  %v250_v13 = vld [vmem:[%s2073_s0 + $0x18] sm:$0xff]  ;;  %v111_v15 = vld [vmem:[%s2076_s3 + $0x28] sm:$0xff] }
   0x5   :  { %v1433_v10 = vpack.c.bf16 %v422_v7, %v421_v5  ;;  %1328 = vmatprep.mubr.msk.f32.mxu1 %vm272_vm1, %v249_v8  ;;  %v110_v14 = vld [vmem:[%s2076_s3 + $0x20] sm:$0xff]  ;;  %v423_v17 = vld [vmem:[%s2078_s5 + $0x10] sm:$0xf]  ;;  %v113_v21 = vld [vmem:[%s2076_s3 + $0x38] sm:$0xff] }
   0x6   :  { %1402 = vmatprep.subr.bf16.mxu0 %v1401_v6  ;;  %v251_v16 = vld [vmem:[%s2073_s0 + $0x20] sm:$0xff]  ;;  %v1409_v19 = vpack.c.bf16 %v111_v15, %v110_v14  ;;  %v112_v20 = vld [vmem:[%s2076_s3 + $0x30] sm:$0xff]  ;;  %v252_v22 = vld [vmem:[%s2073_s0 + $0x28] sm:$0xff] }
   0x7   :  { %1434 = vmatprep.subr.bf16.mxu1 %v1433_v10  ;;  %1404 = vmatpush3.bf16.msra.mxu0 %v1401_v6  ;;  %v253_v23 = vld [vmem:[%s2073_s0 + $0x30] sm:$0xff]  ;;  %v1413_v25 = vpack.c.bf16 %v113_v21, %v112_v20  ;;  %v114_v26 = vld [vmem:[%s2076_s3 + $0x40] sm:$0xff]  ;;  %v115_v27 = vld [vmem:[%s2076_s3 + $0x48] sm:$0xff] }
   0x8   :  { %1436 = vmatpush3.bf16.msra.mxu1 %v1433_v10  ;;  %1406 = vmatprep.subr.bf16.mxu0 %v1405_v12  ;;  %v254_v28 = vld [vmem:[%s2073_s0 + $0x38] sm:$0xff]  ;;  %v1689_v29 = vld [vmem:[%s2075_s2] ss:$0 sm:$0xff] }
   0x9   :  { %1329 = vmatmul.mubr.msk.f32.gmra.mrb[2].mxu1 %vm272_vm1, %v250_v13  ;;  %1341 = vmatprep.subr.msk.mxu1 %vm456_vm2, %v423_v17 }
   0xa   :  { %1331 = vmatprep.mubr.msk.f32.mxu1 %vm272_vm1, %v251_v16 }
   0xb   :  { %1408 = vmatpush3.bf16.msra.mxu0 %v1405_v12 }
   0xc   :  { %1410 = vmatprep.subr.bf16.mxu0 %v1409_v19  ;;  %1342 = vmatpush3.msk.msra.mxu1 %vm456_vm2, %v423_v17 }
   0xd   :  { %1332 = vmatmul.mubr.msk.f32.gmra.mrb[4].mxu1 %vm272_vm1, %v252_v22 }
   0xe   :  { %1334 = vmatprep.mubr.msk.f32.mxu1 %vm272_vm1, %v253_v23 }
   0xf   :  { %19 = vsyncpa [#allocation4], 0  ;;  %1412 = vmatpush3.bf16.msra.mxu0 %v1409_v19  ;;  %v1694_v30 = vld [vmem:[%s2074_s1] sm:$0xff]  ;;  %vm431_vm3 = vcmask 162816   ;;  %vm74_vm4 = vcmp.eq.s32.totalorder %v1672_v24, %v1689_v29  ;;  %v1417_v31 = vpack.c.bf16 %v115_v27, %v114_v26  ;;  %v1530_v32 = vmov 1.0   ;;  %v116_v33 = vld [vmem:[%s2076_s3 + $0x50] sm:$0xff] }
  0x10   :  { %1414 = vmatprep.subr.bf16.mxu0 %v1413_v25  ;;  %1311 = vmatprep.mubr.msk.f32.mxu0 %vm74_vm4, %v1530_v32  ;;  %v117_v34 = vld [vmem:[%s2076_s3 + $0x58] sm:$0xff]  ;;  %v1710_v35 = vld [vmem:[%s2074_s1 + $0x8] sm:$0xff]  ;;  %v1715_v36 = vld [vmem:[%s2074_s1 + $0x10] sm:$0xff]  ;;  %v63_v49 = vadd.s32 8, %v1672_v24  ;;  %v64_v50 = vadd.s32 16, %v1672_v24  ;;  %v65_v51 = vadd.s32 24, %v1672_v24 }
  0x11   :  { %1335 = vmatmul.mubr.msk.f32.gmra.mrb[6].mxu1 %vm272_vm1, %v254_v28  ;;  %v1421_v37 = vpack.c.bf16 %v117_v34, %v116_v33  ;;  %v118_v38 = vld [vmem:[%s2076_s3 + $0x60] sm:$0xff]  ;;  %v119_v39 = vld [vmem:[%s2076_s3 + $0x68] sm:$0xff]  ;;  %v1730_v40 = vld [vmem:[%s2074_s1 + $0x18] sm:$0xff]  ;;  %v66_v52 = vadd.s32 32, %v1672_v24  ;;  %v67_v53 = vadd.s32 40, %v1672_v24  ;;  %v68_v54 = vadd.s32 48, %v1672_v24 }
  0x12   :  { %1343 = vmatprep.mubr.msk.f32.mxu1 %vm431_vm3, %v1694_v30  ;;  %v1735_v41 = vld [vmem:[%s2074_s1 + $0x20] sm:$0xff]  ;;  %v1425_v42 = vpack.c.bf16 %v119_v39, %v118_v38  ;;  %v120_v43 = vld [vmem:[%s2076_s3 + $0x70] sm:$0xff]  ;;  %v121_v44 = vld [vmem:[%s2076_s3 + $0x78] sm:$0xff]  ;;  %vm75_vm5 = vcmp.eq.s32.totalorder %v63_v49, %v1689_v29  ;;  %vm76_vm6 = vcmp.eq.s32.totalorder %v64_v50, %v1689_v29  ;;  %vm77_vm7 = vcmp.eq.s32.totalorder %v65_v51, %v1689_v29  ;;  %s1532_s21 = smov 88   ;;  %s1534_s23 = smov 20  }
  0x13   :  { %1416 = vmatpush3.bf16.msra.mxu0 %v1413_v25  ;;  %v1750_v45 = vld [vmem:[%s2074_s1 + $0x28] sm:$0xff]  ;;  %v1755_v46 = vld [vmem:[%s2074_s1 + $0x30] sm:$0xff]  ;;  %v1429_v47 = vpack.c.bf16 %v121_v44, %v120_v43  ;;  %v1764_v48 = vld [vmem:[%s2074_s1 + $0x38] sm:$0xff]  ;;  %vm78_vm8 = vcmp.eq.s32.totalorder %v66_v52, %v1689_v29  ;;  %vm79_vm9 = vcmp.eq.s32.totalorder %v67_v53, %v1689_v29  ;;  %v69_v55 = vadd.s32 56, %v1672_v24  ;;  %s1535_s5 = smov 108  }
  0x14   :  { %1418 = vmatprep.subr.bf16.mxu0 %v1417_v31  ;;  %vm80_vm10 = vcmp.eq.s32.totalorder %v68_v54, %v1689_v29  ;;  %vm48_vm12 = vcmask 490496   ;;  %v1531_v56 = vmov 0.0   ;;  %v1179_v1 = vld [vmem:[%s2080_s7] ss:$0 sm:$0xff]  ;;  %vm978_vm15 = vcmask 523264  }
  0x15   :  { %1344 = vmatmul.mubr.msk.f32.vlgmr.msra.gmra.mrb[8].mxu1 %vm431_vm3, %v1710_v35  ;;  %vm81_vm11 = vcmp.eq.s32.totalorder %v69_v55, %v1689_v29  ;;  %50 = vst.msk [vmem:[#allocation2 + $0x8] sm:$0xff] %vm48_vm12, %v1531_v56  ;;  %49 = vst.msk [vmem:[#allocation2] sm:$0xff] %vm48_vm12, %v1531_v56  ;;  %v1178_v52 = vld [vmem:[%s2079_s6] ss:$0 sm:$0xff]  ;;  %s1533_s6 = smov 40  }
  0x16   :  { %1346 = vmatprep.mubr.msk.f32.mxu1 %vm431_vm3, %v1715_v36  ;;  %51 = vst.msk [vmem:[#allocation2 + $0x10] sm:$0xff] %vm48_vm12, %v1531_v56  ;;  %52 = vst.msk [vmem:[#allocation2 + $0x18] sm:$0xff] %vm48_vm12, %v1531_v56 }
  0x17   :  { %1420 = vmatpush3.bf16.msra.mxu0 %v1417_v31  ;;  %53 = vst.msk [vmem:[#allocation2 + $0x20] sm:$0xff] %vm48_vm12, %v1531_v56  ;;  %54 = vst.msk [vmem:[#allocation2 + $0x28] sm:$0xff] %vm48_vm12, %v1531_v56 }
  0x18   :  { %1422 = vmatprep.subr.bf16.mxu0 %v1421_v37  ;;  %55 = vst.msk [vmem:[#allocation2 + $0x30] sm:$0xff] %vm48_vm12, %v1531_v56  ;;  %56 = vst.msk [vmem:[#allocation2 + $0x38] sm:$0xff] %vm48_vm12, %v1531_v56 }
  0x19   :  { %1347 = vmatmul.mubr.msk.f32.gmra.mrb[10].mxu1 %vm431_vm3, %v1730_v40 }
  0x1a   :  { %1349 = vmatprep.mubr.msk.f32.mxu1 %vm431_vm3, %v1735_v41 }
  0x1b   :  { %1424 = vmatpush3.bf16.msra.mxu0 %v1421_v37 }
  0x1c   :  { %1426 = vmatprep.subr.bf16.mxu0 %v1425_v42  ;;  %v99_v17 = vld [vmem:[#allocation2 + $0x8] sm:$0xff]  ;;  %v98_v19 = vld [vmem:[#allocation2] sm:$0xff] }
  0x1d   :  { %1350 = vmatmul.mubr.msk.f32.gmra.mrb[12].mxu1 %vm431_vm3, %v1750_v45  ;;  %v101_v24 = vld [vmem:[#allocation2 + $0x18] sm:$0xff]  ;;  %v100_v25 = vld [vmem:[#allocation2 + $0x10] sm:$0xff] }
  0x1e   :  { %1352 = vmatprep.mubr.msk.f32.mxu1 %vm431_vm3, %v1755_v46  ;;  %v103_v31 = vld [vmem:[#allocation2 + $0x28] sm:$0xff] }
  0x1f   :  { %1428 = vmatpush3.bf16.msra.mxu0 %v1425_v42  ;;  %v105_v39 = vld [vmem:[#allocation2 + $0x38] sm:$0xff]  ;;  %v104_v42 = vld [vmem:[#allocation2 + $0x30] sm:$0xff] }
  0x20   :  { %1430 = vmatprep.subr.bf16.mxu0 %v1429_v47 }
  0x21   :  { %1353 = vmatmul.mubr.msk.f32.gmra.mrb[14].mxu1 %vm431_vm3, %v1764_v48 }
  0x23   :  { %1432 = vmatpush3.bf16.msra.mxu0 %v1429_v47 }
  0x26   :  { %1312 = vmatmul.mubr.msk.f32.vlgmr.msra.gmra.mrb[0].mxu0 %vm75_vm5, %v1530_v32 }
  0x27   :  { %1314 = vmatprep.mubr.msk.f32.mxu0 %vm76_vm6, %v1530_v32 }
  0x2a   :  { %1315 = vmatmul.mubr.msk.f32.gmra.mrb[2].mxu0 %vm77_vm7, %v1530_v32 }
  0x2b   :  { %1317 = vmatprep.mubr.msk.f32.mxu0 %vm78_vm8, %v1530_v32 }
  0x2e   :  { %1318 = vmatmul.mubr.msk.f32.gmra.mrb[4].mxu0 %vm79_vm9, %v1530_v32 }
  0x2f   :  { %1320 = vmatprep.mubr.msk.f32.mxu0 %vm80_vm10, %v1530_v32 }
  0x32   :  { %1321 = vmatmul.mubr.msk.f32.gmra.mrb[6].mxu0 %vm81_vm11, %v1530_v32  ;;  %v102_v32 = vld [vmem:[#allocation2 + $0x20] sm:$0xff] }
  0xd7   :  { %v1790_v57 = vpop.f32.mrb[0].mxu1 }
  0xd8   :  { %v1792_v58 = vpop.f32.mrb[1].mxu1 }
  0xdc   :  { %v1794_v59 = vpop.f32.mrb[2].mxu1 }
  0xdd   :  { %v1796_v60 = vpop.f32.mrb[3].mxu1 }
  0xe0   :  { %v1798_v61 = vpop.f32.mrb[4].mxu1 }
  0xe1   :  { %v1800_v62 = vpop.f32.mrb[5].mxu1 }
  0xe4   :  { %v1802_v63 = vpop.f32.mrb[6].mxu1 }
  0xe5   :  { %v1804_v0 = vpop.f32.mrb[7].mxu1 }
  0xe8   :  { %v1345_v2 = vpop.f32.mrb[8].mxu1 }
  0xe9   :  { %v526_v3 = vpop.f32.mrb[9].mxu1  ;;  %v1812_v7 = vadd.f32 %v1345_v2, %v1179_v1 }
  0xea   :  { %v1809_v4 = vadd.f32 %v1179_v1, %v526_v3 }
  0xec   :  { %v1348_v5 = vpop.f32.mrb[10].mxu1  ;;  %613 = vrot.lane.b32.xlu0 %v1809_v4, %s1532_s21 }
  0xed   :  { %v536_v6 = vpop.f32.mrb[11].mxu1  ;;  %v1816_v9 = vadd.f32 %v1348_v5, %v1179_v1 }
  0xee   :  { %v1814_v8 = vadd.f32 %v1179_v1, %v536_v6 }
  0xf0   :  { %v1351_v10 = vpop.f32.mrb[12].mxu1  ;;  %617 = vrot.lane.b32.xlu1 %v1814_v8, %s1532_s21  ;;  %615 = vrot.lane.b32.xlu0 %v1812_v7, %s1532_s21 }
  0xf1   :  { %v546_v11 = vpop.f32.mrb[13].mxu1  ;;  %v1822_v13 = vadd.f32 %v1351_v10, %v1179_v1 }
  0xf2   :  { %v1820_v12 = vadd.f32 %v1179_v1, %v546_v11 }
  0xf4   :  { %v1354_v14 = vpop.f32.mrb[14].mxu1  ;;  %619 = vrot.lane.b32.xlu1 %v1816_v9, %s1532_s21  ;;  %621 = vrot.lane.b32.xlu0 %v1820_v12, %s1532_s21 }
  0xf5   :  { %v556_v15 = vpop.f32.mrb[15].mxu1  ;;  %v1828_v18 = vadd.f32 %v1354_v14, %v1179_v1 }
  0xf6   :  { %v1826_v16 = vadd.f32 %v1179_v1, %v556_v15 }
  0xf8   :  { %623 = vrot.lane.b32.xlu1 %v1822_v13, %s1532_s21  ;;  %625 = vrot.lane.b32.xlu0 %v1826_v16, %s1532_s21 }
  0xf9   :  { %v1313_v20 = vpop.f32.mrb[0].mxu0 }
  0xfa   :  { %v228_v21 = vadd.f32 %v1313_v20, %v99_v17  ;;  %v188_v22 = vpop.f32.mrb[1].mxu0 }
  0xfb   :  { %v227_v23 = vadd.f32 %v188_v22, %v98_v19 }
  0xfc   :  { %237 = vst.msk [vmem:[#allocation2 + $0x8] sm:$0xff] %vm48_vm12, %v228_v21  ;;  %627 = vrot.lane.b32.xlu1 %v1828_v18, %s1532_s21 }
  0xfd   :  { %236 = vst.msk [vmem:[#allocation2] sm:$0xff] %vm48_vm12, %v227_v23  ;;  %v1316_v26 = vpop.f32.mrb[2].mxu0 }
  0xfe   :  { %v230_v27 = vadd.f32 %v1316_v26, %v101_v24  ;;  %v198_v28 = vpop.f32.mrb[3].mxu0 }
  0xff   :  { %v229_v29 = vadd.f32 %v198_v28, %v100_v25 }
 0x100   :  { %239 = vst.msk [vmem:[#allocation2 + $0x18] sm:$0xff] %vm48_vm12, %v230_v27 }
 0x101   :  { %238 = vst.msk [vmem:[#allocation2 + $0x10] sm:$0xff] %vm48_vm12, %v229_v29  ;;  %v1319_v33 = vpop.f32.mrb[4].mxu0 }
 0x102   :  { %v232_v34 = vadd.f32 %v1319_v33, %v103_v31  ;;  %v208_v37 = vpop.f32.mrb[5].mxu0 }
 0x103   :  { %v231_v38 = vadd.f32 %v208_v37, %v102_v32  ;;  %v265_v53 = vld [vmem:[#allocation2 + $0x8] sm:$0xff] }
 0x104   :  { %241 = vst.msk [vmem:[#allocation2 + $0x28] sm:$0xff] %vm48_vm12, %v232_v34  ;;  %v264_v50 = vld [vmem:[#allocation2] sm:$0xff]  ;;  %v373_v56 = vadd.f32 %v1790_v57, %v265_v53 }
 0x105   :  { %240 = vst.msk [vmem:[#allocation2 + $0x20] sm:$0xff] %vm48_vm12, %v231_v38  ;;  %v1322_v43 = vpop.f32.mrb[6].mxu0  ;;  %v368_v51 = vadd.f32 %v1792_v58, %v264_v50 }
 0x106   :  { %v234_v44 = vadd.f32 %v1322_v43, %v105_v39  ;;  %v218_v47 = vpop.f32.mrb[7].mxu0  ;;  %v1851_v6 = vadd.f32 %v1178_v52, %v373_v56 }
 0x107   :  { %v233_v49 = vadd.f32 %v218_v47, %v104_v42  ;;  %v1845_v55 = vadd.f32 %v1178_v52, %v368_v51  ;;  %v267_v2 = vld [vmem:[#allocation2 + $0x18] sm:$0xff] }
 0x108   :  { %243 = vst.msk [vmem:[#allocation2 + $0x38] sm:$0xff] %vm48_vm12, %v234_v44  ;;  %v266_v54 = vld [vmem:[#allocation2 + $0x10] sm:$0xff]  ;;  %v383_v58 = vadd.f32 %v1794_v59, %v267_v2  ;;  %v566_v57 = vadd.f32 %v1812_v7, %v1851_v6 }
 0x109   :  { %242 = vst.msk [vmem:[#allocation2 + $0x30] sm:$0xff] %vm48_vm12, %v233_v49  ;;  %v378_v1 = vadd.f32 %v1796_v60, %v266_v54  ;;  %v565_v5 = vadd.f32 %v1809_v4, %v1845_v55 }
 0x10a   :  { %v1859_v60 = vadd.f32 %v1178_v52, %v383_v58 }
 0x10b   :  { %v1854_v10 = vadd.f32 %v1178_v52, %v378_v1  ;;  %v269_v14 = vld [vmem:[#allocation2 + $0x28] sm:$0xff]  ;;  %v573_v17 = vmul.f32 0.5, %v565_v5 }
 0x10c   :  { %v268_v3 = vld [vmem:[#allocation2 + $0x20] sm:$0xff]  ;;  %v393_v19 = vadd.f32 %v1798_v61, %v269_v14  ;;  %v568_v22 = vadd.f32 %v1816_v9, %v1859_v60 }
 0x10d   :  { %v388_v11 = vadd.f32 %v1800_v62, %v268_v3  ;;  %v567_v4 = vadd.f32 %v1814_v8, %v1854_v10  ;;  %1474 = vtanh.f32 %v573_v17  ;;  %v574_v62 = vmul.f32 0.5, %v566_v57 }
 0x10e   :  { %v1869_v23 = vadd.f32 %v1178_v52, %v393_v19  ;;  %v576_v25 = vmul.f32 0.5, %v568_v22 }
 0x10f   :  { %v1864_v20 = vadd.f32 %v1178_v52, %v388_v11  ;;  %v271_v21 = vld [vmem:[#allocation2 + $0x38] sm:$0xff]  ;;  %v575_v7 = vmul.f32 0.5, %v567_v4  ;;  %1476 = vtanh.f32 %v574_v62 }
 0x110   :  { %v270_v15 = vld [vmem:[#allocation2 + $0x30] sm:$0xff]  ;;  %v403_v8 = vadd.f32 %v1802_v63, %v271_v21 }
 0x111   :  { %v398_v59 = vadd.f32 %v1804_v0, %v270_v15  ;;  %v569_v24 = vadd.f32 %v1820_v12, %v1864_v20  ;;  %v570_v0 = vadd.f32 %v1822_v13, %v1869_v23  ;;  %1478 = vtanh.f32 %v575_v7 }
 0x112   :  { %v1880_v27 = vadd.f32 %v1178_v52, %v403_v8  ;;  %1480 = vtanh.f32 %v576_v25 }
 0x113   :  { %v1873_v61 = vadd.f32 %v1178_v52, %v398_v59  ;;  %v577_v26 = vmul.f32 0.5, %v569_v24  ;;  %v578_v28 = vmul.f32 0.5, %v570_v0 }
 0x114   :  { %v572_v29 = vadd.f32 %v1828_v18, %v1880_v27 }
 0x115   :  { %v571_v9 = vadd.f32 %v1826_v16, %v1873_v61  ;;  %1482 = vtanh.f32 %v577_v26 }
 0x116   :  { %1484 = vtanh.f32 %v578_v28  ;;  %v580_v31 = vmul.f32 0.5, %v572_v29 }
 0x117   :  { %v579_v12 = vmul.f32 0.5, %v571_v9  ;;  %v1475_v63 = vpop.eup %1474 }
 0x118   :  { %v589_v13 = vadd.f32 1.0, %v1475_v63 }
 0x119   :  { %1486 = vtanh.f32 %v579_v12  ;;  %v1477_v32 = vpop.eup %1476 }
 0x11a   :  { %1488 = vtanh.f32 %v580_v31  ;;  %v1884_v37 = vmul.f32 0.5, %v589_v13  ;;  %v590_v38 = vadd.f32 1.0, %v1477_v32  ;;  %v781_v31 = vld [vmem:[%s2081_s8] sm:$0xff] }
 0x11b   :  { %v1479_v33 = vpop.eup %1478 }
 0x11c   :  { %v1481_v34 = vpop.eup %1480  ;;  %v591_v16 = vadd.f32 1.0, %v1479_v33  ;;  %v1890_v47 = vmul.f32 0.5, %v590_v38 }
 0x11d   :  { %v592_v49 = vadd.f32 1.0, %v1481_v34 }
 0x11e   :  { %v1888_v18 = vmul.f32 0.5, %v591_v16  ;;  %v783_v16 = vld [vmem:[%s2081_s8 + $0x10] sm:$0xf] }
 0x11f   :  { %v1483_v39 = vpop.eup %1482  ;;  %v1896_v1 = vmul.f32 0.5, %v592_v49 }
 0x120   :  { %v1485_v44 = vpop.eup %1484  ;;  %v593_v50 = vadd.f32 1.0, %v1483_v39  ;;  %v694_v39 = vsub.f32 1.0, %v1890_v47 }
 0x121   :  { %v594_v3 = vadd.f32 1.0, %v1485_v44 }
 0x122   :  { %v1898_v2 = vmul.f32 0.5, %v593_v50 }
 0x123   :  { %v1487_v51 = vpop.eup %1486  ;;  %v1904_v57 = vmul.f32 0.5, %v594_v3  ;;  %v696_v3 = vsub.f32 1.0, %v1896_v1 }
 0x124   :  { %v595_v5 = vadd.f32 1.0, %v1487_v51  ;;  %v1489_v58 = vpop.eup %1488  ;;  %v693_v51 = vsub.f32 1.0, %v1884_v37 }
 0x125   :  { %v596_v4 = vadd.f32 1.0, %v1489_v58 }
 0x126   :  { %v1906_v19 = vmul.f32 0.5, %v595_v5 }
 0x127   :  { %v1912_v7 = vmul.f32 0.5, %v596_v4 }
 0x15e   :  { %v614_v42 = vpop.permute.xlu0 %613 }
 0x15f   :  { %v637_v43 = vmul.f32 %v614_v42, %v1884_v37 }
 0x161   :  { %653 = vrot.lane.b32.xlu0 %v637_v43, %s1533_s6 }
 0x162   :  { %v618_v52 = vpop.permute.xlu1 %617  ;;  %v616_v53 = vpop.permute.xlu0 %615 }
 0x163   :  { %v639_v54 = vmul.f32 %v618_v52, %v1888_v18  ;;  %v638_v56 = vmul.f32 %v616_v53, %v1890_v47 }
 0x165   :  { %655 = vrot.lane.b32.xlu1 %v638_v56, %s1533_s6  ;;  %657 = vrot.lane.b32.xlu0 %v639_v54, %s1533_s6 }
 0x166   :  { %v620_v11 = vpop.permute.xlu1 %619  ;;  %v622_v14 = vpop.permute.xlu0 %621 }
 0x167   :  { %v640_v15 = vmul.f32 %v620_v11, %v1896_v1  ;;  %v641_v17 = vmul.f32 %v622_v14, %v1898_v2 }
 0x169   :  { %659 = vrot.lane.b32.xlu1 %v640_v15, %s1533_s6  ;;  %661 = vrot.lane.b32.xlu0 %v641_v17, %s1533_s6  ;;  %v695_v15 = vsub.f32 1.0, %v1888_v18 }
 0x16a   :  { %v624_v59 = vpop.permute.xlu1 %623  ;;  %v626_v21 = vpop.permute.xlu0 %625 }
 0x16b   :  { %v642_v62 = vmul.f32 %v624_v59, %v1904_v57  ;;  %v643_v22 = vmul.f32 %v626_v21, %v1906_v19 }
 0x16d   :  { %663 = vrot.lane.b32.xlu1 %v642_v62, %s1533_s6  ;;  %665 = vrot.lane.b32.xlu0 %v643_v22, %s1533_s6  ;;  %v698_v62 = vsub.f32 1.0, %v1904_v57 }
 0x16e   :  { %v628_v24 = vpop.permute.xlu1 %627 }
 0x16f   :  { %v644_v8 = vmul.f32 %v628_v24, %v1912_v7 }
 0x171   :  { %667 = vrot.lane.b32.xlu1 %v644_v8, %s1533_s6 }
 0x175   :  { %741 = vrot.lane.b32.xlu1 %v1694_v30, %s1534_s23 }
 0x179   :  { %743 = vrot.lane.b32.xlu1 %v1710_v35, %s1534_s23 }
 0x17d   :  { %745 = vrot.lane.b32.xlu1 %v1715_v36, %s1534_s23 }
 0x181   :  { %747 = vrot.lane.b32.xlu1 %v1730_v40, %s1534_s23 }
 0x185   :  { %749 = vrot.lane.b32.xlu1 %v1735_v41, %s1534_s23 }
 0x189   :  { %751 = vrot.lane.b32.xlu1 %v1750_v45, %s1534_s23 }
 0x18d   :  { %753 = vrot.lane.b32.xlu1 %v1755_v46, %s1534_s23 }
 0x191   :  { %755 = vrot.lane.b32.xlu1 %v1764_v48, %s1534_s23 }
 0x1d3   :  { %v654_v25 = vpop.permute.xlu0 %653 }
 0x1d4   :  { %v677_v30 = vadd.f32 %v654_v25, %v1845_v55  ;;  %v697_v25 = vsub.f32 1.0, %v1898_v2 }
 0x1d7   :  { %v656_v0 = vpop.permute.xlu1 %655  ;;  %v658_v40 = vpop.permute.xlu0 %657 }
 0x1d8   :  { %v678_v26 = vadd.f32 %v656_v0, %v1851_v6  ;;  %v679_v41 = vadd.f32 %v658_v40, %v1854_v10 }
 0x1da   :  { %1490 = vtanh.f32 %v678_v26 }
 0x1db   :  { %v660_v35 = vpop.permute.xlu1 %659  ;;  %1492 = vtanh.f32 %v677_v30  ;;  %v662_v46 = vpop.permute.xlu0 %661  ;;  %v964_v30 = vld [vmem:[%s2083_s10 + $0x8] sm:$0xff] }
 0x1dc   :  { %v680_v36 = vadd.f32 %v660_v35, %v1859_v60  ;;  %v681_v55 = vadd.f32 %v662_v46, %v1864_v20  ;;  %v699_v46 = vsub.f32 1.0, %v1906_v19 }
 0x1de   :  { %1494 = vtanh.f32 %v680_v36 }
 0x1df   :  { %v664_v45 = vpop.permute.xlu1 %663  ;;  %1496 = vtanh.f32 %v679_v41  ;;  %v666_v60 = vpop.permute.xlu0 %665  ;;  %v966_v41 = vld [vmem:[%s2083_s10 + $0x18] sm:$0xff] }
 0x1e0   :  { %v682_v48 = vadd.f32 %v664_v45, %v1869_v23  ;;  %v683_v10 = vadd.f32 %v666_v60, %v1873_v61  ;;  %v782_v61 = vld [vmem:[%s2081_s8 + $0x8] sm:$0xff] }
 0x1e1   :  { %v1437_v32 = vpack.c.bf16 %v782_v61, %v781_v31 }
 0x1e2   :  { %1498 = vtanh.f32 %v682_v48 }
 0x1e3   :  { %1500 = vtanh.f32 %v681_v55  ;;  %v668_v12 = vpop.permute.xlu1 %667  ;;  %1438 = vmatprep.subr.bf16.mxu1 %v1437_v32 }
 0x1e4   :  { %v1491_v9 = vpop.eup %1490  ;;  %1502 = vtanh.f32 %v683_v10  ;;  %v684_v23 = vadd.f32 %v668_v12, %v1880_v27  ;;  %1440 = vmatpush3.bf16.msra.mxu1 %v1437_v32 }
 0x1e5   :  { %711 = vrot.lane.b32.xlu0 %v1491_v9, %s1535_s5  ;;  %v1493_v6 = vpop.eup %1492  ;;  %1359 = vmatprep.subr.msk.mxu1 %vm456_vm2, %v783_v16 }
 0x1e6   :  { %1504 = vtanh.f32 %v684_v23 }
 0x1e7   :  { %v742_v33 = vpop.permute.xlu1 %741 }
 0x1e8   :  { %v1495_v28 = vpop.eup %1494  ;;  %1360 = vmatpush3.msk.msra.mxu1 %vm456_vm2, %v783_v16  ;;  %v765_v53 = vmul.f32 %v742_v33, %v1884_v37  ;;  %v968_v33 = vld [vmem:[%s2083_s10 + $0x28] sm:$0xff]  ;;  %v969_v16 = vld [vmem:[%s2083_s10 + $0x30] sm:$0xff] }
 0x1e9   :  { %709 = vrot.lane.b32.xlu0 %v1493_v6, %s1535_s5  ;;  %v1497_v29 = vpop.eup %1496 }
 0x1eb   :  { %v744_v34 = vpop.permute.xlu1 %743 }
 0x1ec   :  { %v1499_v63 = vpop.eup %1498  ;;  %v766_v43 = vmul.f32 %v744_v34, %v1890_v47 }
 0x1ed   :  { %715 = vrot.lane.b32.xlu0 %v1495_v28, %s1535_s5  ;;  %v1501_v20 = vpop.eup %1500  ;;  %v700_v28 = vsub.f32 1.0, %v1912_v7 }
 0x1ee   :  { %v1503_v13 = vpop.eup %1502 }
 0x1ef   :  { %v746_v38 = vpop.permute.xlu1 %745 }
 0x1f0   :  { %v1505_v27 = vpop.eup %1504  ;;  %v767_v4 = vmul.f32 %v746_v38, %v1888_v18  ;;  %v963_v18 = vld [vmem:[%s2083_s10] sm:$0xff]  ;;  %v970_v38 = vld [vmem:[%s2083_s10 + $0x38] sm:$0xff] }
 0x1f1   :  { %713 = vrot.lane.b32.xlu0 %v1497_v29, %s1535_s5  ;;  %v1441_v40 = vpack.c.bf16 %v964_v30, %v963_v18 }
 0x1f3   :  { %v748_v49 = vpop.permute.xlu1 %747  ;;  %1442 = vmatprep.subr.bf16.mxu0 %v1441_v40  ;;  %1457 = vmatprep.subr.bf16.mxu1 %v1441_v40 }
 0x1f4   :  { %v768_v11 = vmul.f32 %v748_v49, %v1896_v1  ;;  %1444 = vmatpush3.bf16.msra.mxu0 %v1441_v40 }
 0x1f5   :  { %719 = vrot.lane.b32.xlu0 %v1499_v63, %s1535_s5 }
 0x1f7   :  { %v750_v5 = vpop.permute.xlu1 %749 }
 0x1f8   :  { %v769_v35 = vmul.f32 %v750_v5, %v1898_v2 }
 0x1f9   :  { %717 = vrot.lane.b32.xlu0 %v1501_v20, %s1535_s5 }
 0x1fb   :  { %v752_v59 = vpop.permute.xlu1 %751 }
 0x1fc   :  { %v770_v24 = vmul.f32 %v752_v59, %v1904_v57  ;;  %v965_v57 = vld [vmem:[%s2083_s10 + $0x10] sm:$0xff] }
 0x1fd   :  { %721 = vrot.lane.b32.xlu0 %v1503_v13, %s1535_s5  ;;  %v1445_v45 = vpack.c.bf16 %v966_v41, %v965_v57 }
 0x1ff   :  { %v754_v0 = vpop.permute.xlu1 %753  ;;  %1446 = vmatprep.subr.bf16.mxu0 %v1445_v45 }
 0x200   :  { %v771_v6 = vmul.f32 %v754_v0, %v1906_v19  ;;  %1448 = vmatpush3.bf16.msra.mxu0 %v1445_v45 }
 0x201   :  { %723 = vrot.lane.b32.xlu0 %v1505_v27, %s1535_s5  ;;  %v967_v27 = vld [vmem:[%s2083_s10 + $0x20] sm:$0xff] }
 0x202   :  { %v1449_v34 = vpack.c.bf16 %v968_v33, %v967_v27 }
 0x203   :  { %v756_v2 = vpop.permute.xlu1 %755 }
 0x204   :  { %v772_v12 = vmul.f32 %v756_v2, %v1912_v7  ;;  %1450 = vmatprep.subr.bf16.mxu0 %v1449_v34 }
 0x205   :  { %1452 = vmatpush3.bf16.msra.mxu0 %v1449_v34 }
 0x257   :  { %v712_v42 = vpop.permute.xlu0 %711 }
 0x258   :  { %v734_v44 = vmul.f32 %v712_v42, %v694_v39  ;;  %v1453_v39 = vpack.c.bf16 %v970_v38, %v969_v16  ;;  %v1189_v42 = vld [vmem:[%s2082_s9] ss:$0 sm:$0xff] }
 0x25a   :  { %v774_v50 = vadd.f32 %v766_v43, %v734_v44  ;;  %1454 = vmatprep.subr.bf16.mxu0 %v1453_v39 }
 0x25b   :  { %v710_v52 = vpop.permute.xlu0 %709  ;;  %1456 = vmatpush3.bf16.msra.mxu0 %v1453_v39 }
 0x25c   :  { %v733_v54 = vmul.f32 %v710_v52, %v693_v51  ;;  %801 = vrot.lane.b32.xlu1 %v774_v50, %s1535_s5 }
 0x25e   :  { %v773_v56 = vadd.f32 %v765_v53, %v733_v54 }
 0x25f   :  { %v716_v58 = vpop.permute.xlu0 %715 }
 0x260   :  { %v736_v14 = vmul.f32 %v716_v58, %v696_v3  ;;  %799 = vrot.lane.b32.xlu0 %v773_v56, %s1535_s5 }
 0x262   :  { %v776_v47 = vadd.f32 %v768_v11, %v736_v14 }
 0x263   :  { %v714_v17 = vpop.permute.xlu0 %713 }
 0x264   :  { %v735_v37 = vmul.f32 %v714_v17, %v695_v15  ;;  %805 = vrot.lane.b32.xlu1 %v776_v47, %s1535_s5 }
 0x266   :  { %v775_v21 = vadd.f32 %v767_v4, %v735_v37 }
 0x267   :  { %v720_v22 = vpop.permute.xlu0 %719 }
 0x268   :  { %v738_v1 = vmul.f32 %v720_v22, %v698_v62  ;;  %803 = vrot.lane.b32.xlu0 %v775_v21, %s1535_s5 }
 0x26a   :  { %v778_v8 = vadd.f32 %v770_v24, %v738_v1 }
 0x26b   :  { %v718_v26 = vpop.permute.xlu0 %717 }
 0x26c   :  { %v737_v36 = vmul.f32 %v718_v26, %v697_v25  ;;  %809 = vrot.lane.b32.xlu1 %v778_v8, %s1535_s5 }
 0x26e   :  { %v777_v9 = vadd.f32 %v769_v35, %v737_v36  ;;  %v1199_v35 = vld [vmem:[%s2084_s11] ss:$0 sm:$0xff]  ;;  %s1536_s11 = smov [#allocation3]  }
 0x26f   :  { %v722_v48 = vpop.permute.xlu0 %721  ;;  %s1137_s0 = sshll.u32 %s1536_s11, 4  ;;  %s1138_s0 = int_to_ptr.vmem [resolvable:$true] %s1137_s0 }
 0x270   :  { %v739_v55 = vmul.f32 %v722_v48, %v699_v46  ;;  %807 = vrot.lane.b32.xlu0 %v777_v9, %s1535_s5  ;;  %s1506_s2 = scalar_lea.vmem %s1138_s0, 1024  ;;  %p1511_p1 = scmp.lt.s32.totalorder %s1138_s0, %s1138_s0 }
 0x271   :  { %p1507_p0 = scmp.ne.s32.totalorder %s1138_s0, %s1506_s2  ;;  %p1512_p2 = scmp.lt.s32.totalorder %s1506_s2, %s1506_s2 }
 0x272   :  { %v779_v60 = vadd.f32 %v771_v6, %v739_v55 }
 0x273   :  { %v724_v10 = vpop.permute.xlu0 %723  ;;  %p1513_p3 = por %p1512_p2, %p1511_p1 }
 0x274   :  { %v740_v29 = vmul.f32 %v724_v10, %v700_v28  ;;  %811 = vrot.lane.b32.xlu0 %v779_v60, %s1535_s5 }
 0x275   :  { %p1514_p4 = pnand %p1513_p3, %p1507_p0 }
 0x276   :  { %v780_v23 = vadd.f32 %v772_v12, %v740_v29 }
 0x278   :  { %813 = vrot.lane.b32.xlu1 %v780_v23, %s1535_s5 }
 0x2ce   :  { %v802_v63 = vpop.permute.xlu1 %801 }
 0x2cf   :  { %1125 = vst.msk [vmem:[%s2086_s13 + $0x8] sm:$0xff] %vm431_vm3, %v802_v63 }
 0x2d2   :  { %v800_v19 = vpop.permute.xlu0 %799 }
 0x2d3   :  { %1124 = vst.msk [vmem:[%s2086_s13] sm:$0xff] %vm431_vm3, %v800_v19  ;;  %1361 = vmatprep.mubr.msk.f32.mxu1 %vm431_vm3, %v800_v19 }
 0x2d4   :  { %1362 = vmatmul.mubr.msk.f32.vlgmr.msra.gmra.mrb[16].mxu1 %vm431_vm3, %v802_v63 }
 0x2d5   :  { %1461 = vmatpush3.bf16.msra.mxu1 %v1441_v40 }
 0x2d6   :  { %v806_v7 = vpop.permute.xlu1 %805  ;;  %1458 = vmatprep.subr.bf16.mxu1 %v1445_v45 }
 0x2d7   :  { %1127 = vst.msk [vmem:[%s2086_s13 + $0x18] sm:$0xff] %vm431_vm3, %v806_v7 }
 0x2d9   :  { %1462 = vmatpush3.bf16.msra.mxu1 %v1445_v45 }
 0x2da   :  { %v804_v20 = vpop.permute.xlu0 %803  ;;  %1459 = vmatprep.subr.bf16.mxu1 %v1449_v34 }
 0x2db   :  { %1126 = vst.msk [vmem:[%s2086_s13 + $0x10] sm:$0xff] %vm431_vm3, %v804_v20  ;;  %1364 = vmatprep.mubr.msk.f32.mxu1 %vm431_vm3, %v804_v20 }
 0x2dc   :  { %1365 = vmatmul.mubr.msk.f32.gmra.mrb[18].mxu1 %vm431_vm3, %v806_v7 }
 0x2dd   :  { %1463 = vmatpush3.bf16.msra.mxu1 %v1449_v34 }
 0x2de   :  { %v810_v31 = vpop.permute.xlu1 %809  ;;  %1460 = vmatprep.subr.bf16.mxu1 %v1453_v39 }
 0x2df   :  { %1129 = vst.msk [vmem:[%s2086_s13 + $0x28] sm:$0xff] %vm431_vm3, %v810_v31 }
 0x2e1   :  { %1464 = vmatpush3.bf16.msra.mxu1 %v1453_v39 }
 0x2e2   :  { %v808_v61 = vpop.permute.xlu0 %807 }
 0x2e3   :  { %1128 = vst.msk [vmem:[%s2086_s13 + $0x20] sm:$0xff] %vm431_vm3, %v808_v61  ;;  %1367 = vmatprep.mubr.msk.f32.mxu1 %vm431_vm3, %v808_v61 }
 0x2e4   :  { %1368 = vmatmul.mubr.msk.f32.gmra.mrb[20].mxu1 %vm431_vm3, %v810_v31 }
 0x2e6   :  { %v812_v32 = vpop.permute.xlu0 %811 }
 0x2e7   :  { %1130 = vst.msk [vmem:[%s2086_s13 + $0x30] sm:$0xff] %vm431_vm3, %v812_v32  ;;  %1370 = vmatprep.mubr.msk.f32.mxu1 %vm431_vm3, %v812_v32 }
 0x2ea   :  { %v814_v13 = vpop.permute.xlu1 %813 }
 0x2eb   :  { %1131 = vst.msk [vmem:[%s2086_s13 + $0x38] sm:$0xff] %vm431_vm3, %v814_v13  ;;  %1371 = vmatmul.mubr.msk.f32.gmra.mrb[22].mxu1 %vm431_vm3, %v814_v13 }
 0x3a7   :  { %v1363_v43 = vpop.f32.mrb[16].mxu1 }
 0x3a8   :  { %v906_v44 = vadd.f32 %v1363_v43, %v1189_v42  ;;  %v900_v49 = vpop.f32.mrb[17].mxu1 }
 0x3a9   :  { %v901_v50 = vadd.f32 %v1189_v42, %v900_v49 }
 0x3aa   :  { %v948_v51 = vmul.f32 0.01, %v906_v44  ;;  %vm940_vm13 = vcmp.gt.f32.partialorder %v906_v44, 0.0 }
 0x3ab   :  { %vm939_vm14 = vcmp.gt.f32.partialorder %v901_v50, 0.0  ;;  %v947_v52 = vmul.f32 0.01, %v901_v50 }
 0x3ac   :  { %v956_v54 = vsel %vm940_vm13, %v906_v44, %v948_v51 }
 0x3ad   :  { %v955_v53 = vsel %vm939_vm14, %v901_v50, %v947_v52 }
 0x3ae   :  { %1389 = vmatprep.mubr.msk.f32.mxu0 %vm978_vm15, %v955_v53 }
 0x3af   :  { %v1366_v56 = vpop.f32.mrb[18].mxu1  ;;  %1390 = vmatmul.mubr.msk.f32.vlgmr.msra.gmra.mrb[8].mxu0 %vm978_vm15, %v956_v54 }
 0x3b0   :  { %v916_v3 = vadd.f32 %v1366_v56, %v1189_v42  ;;  %v910_v5 = vpop.f32.mrb[19].mxu1 }
 0x3b1   :  { %v911_v58 = vadd.f32 %v1189_v42, %v910_v5 }
 0x3b2   :  { %v950_v11 = vmul.f32 0.01, %v916_v3  ;;  %vm942_vm0 = vcmp.gt.f32.partialorder %v916_v3, 0.0 }
 0x3b3   :  { %vm941_vm1 = vcmp.gt.f32.partialorder %v911_v58, 0.0  ;;  %v949_v14 = vmul.f32 0.01, %v911_v58 }
 0x3b4   :  { %v958_v15 = vsel %vm942_vm0, %v916_v3, %v950_v11 }
 0x3b5   :  { %v957_v47 = vsel %vm941_vm1, %v911_v58, %v949_v14 }
 0x3b6   :  { %1392 = vmatprep.mubr.msk.f32.mxu0 %vm978_vm15, %v957_v47 }
 0x3b7   :  { %v1369_v17 = vpop.f32.mrb[20].mxu1  ;;  %1393 = vmatmul.mubr.msk.f32.gmra.mrb[10].mxu0 %vm978_vm15, %v958_v15 }
 0x3b8   :  { %v926_v4 = vadd.f32 %v1369_v17, %v1189_v42  ;;  %v920_v37 = vpop.f32.mrb[21].mxu1 }
 0x3b9   :  { %v921_v59 = vadd.f32 %v1189_v42, %v920_v37 }
 0x3ba   :  { %v952_v21 = vmul.f32 0.01, %v926_v4  ;;  %vm944_vm2 = vcmp.gt.f32.partialorder %v926_v4, 0.0 }
 0x3bb   :  { %vm943_vm3 = vcmp.gt.f32.partialorder %v921_v59, 0.0  ;;  %v951_v62 = vmul.f32 0.01, %v921_v59 }
 0x3bc   :  { %v960_v1 = vsel %vm944_vm2, %v926_v4, %v952_v21 }
 0x3bd   :  { %v959_v22 = vsel %vm943_vm3, %v921_v59, %v951_v62 }
 0x3be   :  { %v1372_v24 = vpop.f32.mrb[22].mxu1  ;;  %1395 = vmatprep.mubr.msk.f32.mxu0 %vm978_vm15, %v959_v22 }
 0x3bf   :  { %v936_v8 = vadd.f32 %v1372_v24, %v1189_v42  ;;  %v930_v25 = vpop.f32.mrb[23].mxu1  ;;  %1396 = vmatmul.mubr.msk.f32.gmra.mrb[12].mxu0 %vm978_vm15, %v960_v1 }
 0x3c0   :  { %v931_v0 = vadd.f32 %v1189_v42, %v930_v25 }
 0x3c1   :  { %v954_v26 = vmul.f32 0.01, %v936_v8  ;;  %vm946_vm4 = vcmp.gt.f32.partialorder %v936_v8, 0.0 }
 0x3c2   :  { %vm945_vm5 = vcmp.gt.f32.partialorder %v931_v0, 0.0  ;;  %v953_v18 = vmul.f32 0.01, %v931_v0 }
 0x3c3   :  { %v962_v57 = vsel %vm946_vm4, %v936_v8, %v954_v26 }
 0x3c4   :  { %v961_v30 = vsel %vm945_vm5, %v931_v0, %v953_v18 }
 0x3c5   :  { %1398 = vmatprep.mubr.msk.f32.mxu1 %vm978_vm15, %v961_v30 }
 0x3c6   :  { %1399 = vmatmul.mubr.msk.f32.vlgmr.msra.gmra.mrb[24].mxu1 %vm978_vm15, %v962_v57 }
 0x482   :  { %v1391_v36 = vpop.f32.mrb[8].mxu0 }
 0x483   :  { %v1075_v40 = vadd.f32 %v1391_v36, %v1199_v35  ;;  %v1069_v41 = vpop.f32.mrb[9].mxu0 }
 0x484   :  { %v1070_v45 = vadd.f32 %v1199_v35, %v1069_v41 }
 0x485   :  { %1109 = vst.msk [vmem:[#allocation3 + $0x8] sm:$0xff] %vm978_vm15, %v1075_v40 }
 0x486   :  { %1108 = vst.msk [vmem:[#allocation3] sm:$0xff] %vm978_vm15, %v1070_v45 }
 0x48a   :  { %v1394_v9 = vpop.f32.mrb[10].mxu0 }
 0x48b   :  { %v1085_v46 = vadd.f32 %v1394_v9, %v1199_v35  ;;  %v1079_v48 = vpop.f32.mrb[11].mxu0 }
 0x48c   :  { %v1080_v6 = vadd.f32 %v1199_v35, %v1079_v48 }
 0x48d   :  { %1111 = vst.msk [vmem:[#allocation3 + $0x18] sm:$0xff] %vm978_vm15, %v1085_v46 }
 0x48e   :  { %1110 = vst.msk [vmem:[#allocation3 + $0x10] sm:$0xff] %vm978_vm15, %v1080_v6 }
 0x492   :  { %v1397_v55 = vpop.f32.mrb[12].mxu0 }
 0x493   :  { %v1095_v2 = vadd.f32 %v1397_v55, %v1199_v35  ;;  %v1089_v60 = vpop.f32.mrb[13].mxu0 }
 0x494   :  { %v1090_v28 = vadd.f32 %v1199_v35, %v1089_v60 }
 0x495   :  { %1113 = vst.msk [vmem:[#allocation3 + $0x28] sm:$0xff] %vm978_vm15, %v1095_v2 }
 0x496   :  { %1112 = vst.msk [vmem:[#allocation3 + $0x20] sm:$0xff] %vm978_vm15, %v1090_v28 }
 0x499   :  { %v1400_v10 = vpop.f32.mrb[24].mxu1 }
 0x49a   :  { %v1105_v12 = vadd.f32 %v1400_v10, %v1199_v35  ;;  %v1099_v29 = vpop.f32.mrb[25].mxu1 }
 0x49b   :  { %v1100_v23 = vadd.f32 %v1199_v35, %v1099_v29 }
 0x49c   :  { %1115 = vst.msk [vmem:[#allocation3 + $0x38] sm:$0xff] %vm978_vm15, %v1105_v12 }
 0x49d   :  { %1114 = vst.msk [vmem:[#allocation3 + $0x30] sm:$0xff] %vm978_vm15, %v1100_v23 }
 0x49e   :  { %1517 = shalt.err (!%p1514_p4)
}
 0x49f   :  { %s1518_s19 = scalar_lea.hbm %s2085_s12, 1024 }
 0x4a0   :  { %p1519_p5 = scmp.ne.s32.totalorder %s2085_s12, %s1518_s19  ;;  %p1522_p6 = scmp.lt.u32.totalorder %s1518_s19, %s2085_s12 }
 0x4a2   :  { %p1524_p7 = pnand %p1522_p6, %p1519_p5 }
 0x4a4   :  { %1527 = shalt.err (!%p1524_p7)
}
 0x4a5   :  { %s1537_s22 = smov 128   ;;  %s1538_s6 = smov 8  }
 0x4a6   :  { %1143 = dma.vmem_to_hbm [thread:$0]  %s1138_s0, 1024, %s2085_s12, [#allocation4], %s1537_s22, %s1537_s22, %s1538_s6  }
 0x4a7   :  { %1528 = dma.done.wait [#allocation4], 1024  }
 0x4a8   :  { %1529 = vsyncadd [#allocation4], 4294966272 }
 0x4a9   :  { %1151 = vsyncpa [#allocation4], 1 }

</bundles_post_ra>
